<compile_context>
chip_gen: v6e
topology: v6e:2x2x1
jax: 0.10.0
libtpu: 0.0.40
codegen_flags: <defaults>
</compile_context>

<pallas_src>
import functools

import jax
import jax.numpy as jnp
from jax.experimental import pallas as pl
from jax.experimental.pallas import tpu as pltpu


# ----------------------------------------------------------------------------
# small helpers
# ----------------------------------------------------------------------------
def _round_up(x, m):
    return (x + m - 1) // m * m


def _pad_to(a, axis, size):
    pad = size - a.shape[axis]
    if pad <= 0:
        return a
    widths = [(0, 0)] * a.ndim
    widths[axis] = (0, pad)
    return jnp.pad(a, widths)


def _gelu_tanh(x):
    # torch.nn.GELU(approximate="tanh"). Python-float constants stay weakly typed so the
    # polynomial runs in x's dtype (bf16 on v6e/v7x, f32 on v5e); tanh goes to the EUP.
    c = 0.7978845608028654  # sqrt(2/pi)
    return 0.5 * x * (1.0 + jnp.tanh(c * x * (1.0 + 0.044715 * x * x)))


def _tpu_hw_config():
    """(vmem_capacity_bytes, gelu_dtype, default_tile_rows) for the local TPU generation."""
    try:
        kind = jax.devices()[0].device_kind.lower()
    except Exception:
        kind = ""
    vmem_capacity = None
    try:
        vmem_capacity = int(pltpu.get_tpu_info().vmem_capacity_bytes)
    except Exception:
        vmem_capacity = None
    if not vmem_capacity or vmem_capacity <= 0:
        vmem_capacity = (64 << 20) if "v7" in kind else (128 << 20)
    # v5e has no bf16 VPU/EUP -> keep elementwise GELU math in f32 there (and on unknown parts).
    gelu_dtype = jnp.bfloat16 if ("v6" in kind or "v7" in kind) else jnp.float32
    # bigger row tiles on 128 MiB VMEM parts (v5e/v6e); 512 on v7x (64 MiB per TensorCore).
    tile_rows = 1024 if vmem_capacity >= (96 << 20) else 512
    return vmem_capacity, gelu_dtype, tile_rows


# ----------------------------------------------------------------------------
# Pallas kernel: fused edge-embedding MLP (Linear -> act -> [Linear -> act]* ->
# Linear -> LayerNorm), tiled over edge rows, bf16 matmuls / f32 accumulate.
# ----------------------------------------------------------------------------
def _edge_mlp_kernel(n_hidden_layers, f_out, mask_lanes, gelu_dtype, x_ref, *refs):
    """refs = w_in, b_in, (w_h, b_h)*n_hidden_layers, w_out, b_out, gamma, beta, o_ref."""
    o_ref = refs[-1]
    w = refs[:-1]

    w_in, b_in = w[0], w[1]
    h = jnp.dot(x_ref[...], w_in[...], preferred_element_type=jnp.float32) + b_in[...]
    h = _gelu_tanh(h.astype(gelu_dtype))

    idx = 2
    for _ in range(n_hidden_layers):
        w_h, b_h = w[idx], w[idx + 1]
        idx += 2
        h = jnp.dot(h.astype(jnp.bfloat16), w_h[...],
                    preferred_element_type=jnp.float32) + b_h[...]
        h = _gelu_tanh(h.astype(gelu_dtype))

    w_out, b_out, gamma, beta = w[idx], w[idx + 1], w[idx + 2], w[idx + 3]
    y = jnp.dot(h.astype(jnp.bfloat16), w_out[...],
                preferred_element_type=jnp.float32) + b_out[...]

    # LayerNorm over the true f_out features, two-pass (y - mean) form in f32.
    # Padded output lanes are exact zeros (zero-padded w_out/b_out), so sum(y)/f_out is exact;
    # when the output is lane-padded the centered values are masked before the variance sum.
    inv_n = jnp.float32(1.0 / f_out)
    mean = jnp.sum(y, axis=-1, keepdims=True) * inv_n
    d = y - mean
    if mask_lanes:
        lane = jax.lax.broadcasted_iota(jnp.int32, d.shape, 1)
        d = jnp.where(lane < f_out, d, 0.0)
    var = jnp.sum(d * d, axis=-1, keepdims=True) * inv_n
    yn = d * jax.lax.rsqrt(var + jnp.float32(1e-5))
    o_ref[...] = (yn * gamma[...] + beta[...]).astype(o_ref.dtype)


# ----------------------------------------------------------------------------
# one-time preparation (padded/cast inputs & weights, tiling, VMEM/cost config)
# ----------------------------------------------------------------------------
def prepare_edge_mlp_inputs(edge_attr_static, trainable, params, n_hidden_layers,
                            tile_rows, vmem_capacity_bytes, gelu_dtype,
                            out_dtype=jnp.float32):
    num_edges, _ = edge_attr_static.shape
    hidden = params["w_in"].shape[1]
    f_out = params["w_out"].shape[1]

    # Concatenate static edge attrs with the learnable per-edge tensor ONCE (num_edges rows
    # only — the batch repetition is applied to the OUTPUT, not the input).
    if trainable is not None and trainable.shape[1] > 0:
        x = jnp.concatenate([edge_attr_static, trainable], axis=-1)
    else:
        x = edge_attr_static
    in_dim = x.shape[1]

    # Row tiling over num_edges only; ensure >= 2 grid steps when possible so both v7x
    # TensorCores get work under dimension_semantics=("parallel",).
    rows = _round_up(num_edges, 8)
    tile = max(8, min(_round_up(tile_rows, 8), rows))
    if rows // tile < 2 and rows >= 16:
        tile = _round_up((rows + 1) // 2, 8)
    e_pad = _round_up(rows, tile)
    n_blocks = e_pad // tile

    in_pad = _round_up(in_dim, 8)
    f_pad = _round_up(f_out, 128)        # lane-dense output (no masked partial stores)

    x_in = _pad_to(_pad_to(x.astype(jnp.bfloat16), 0, e_pad), 1, in_pad)

    # weights: bf16 matmul operands, f32 biases / LayerNorm params (zero-padded lanes/rows).
    weights = [_pad_to(params["w_in"], 0, in_pad).astype(jnp.bfloat16), params["b_in"]]
    for i in range(n_hidden_layers):
        weights += [params[f"w_h{i}"].astype(jnp.bfloat16), params[f"b_h{i}"]]
    weights += [
        _pad_to(params["w_out"], 1, f_pad).astype(jnp.bfloat16),
        _pad_to(params["b_out"], 1, f_pad),
        _pad_to(params["ln_gamma"], 1, f_pad),
        _pad_to(params["ln_beta"], 1, f_pad),
    ]

    # --- VMEM budget (accounts for lane/sublane padding of VMEM tiles), capped generation-aware.
    def _vmem_array_bytes(a):
        sub = 16 if a.dtype == jnp.bfloat16 else 8
        r = _round_up(a.shape[0], sub)
        c = _round_up(a.shape[1], 128)
        return r * c * a.dtype.itemsize

    out_itemsize = jnp.dtype(out_dtype).itemsize
    w_vbytes = sum(_vmem_array_bytes(w) for w in weights)
    block_bytes = 2 * _round_up(tile, 16) * _round_up(in_pad, 128) * 2   # dbl-buffered bf16 input
    block_bytes += 2 * _round_up(tile, 8) * f_pad * out_itemsize         # dbl-buffered output
    block_bytes += w_vbytes                                              # single-buffered weights
    block_bytes += 3 * tile * max(_round_up(hidden, 128), f_pad) * 4     # f32 intermediates
    vmem_cap = int(vmem_capacity_bytes) * 3 // 4      # ~48 MiB on 64 MiB parts, ~96 MiB on 128 MiB
    vmem_limit = int(max(32 << 20, min(vmem_cap, int(1.5 * block_bytes) + (4 << 20))))

    # --- cost estimate for XLA scheduling of the surrounding glue.
    flops = 2 * e_pad * (in_pad * hidden + n_hidden_layers * hidden * hidden + hidden * f_pad)
    transcendentals = e_pad * hidden * (n_hidden_layers + 1) + e_pad
    raw_w_bytes = sum(int(w.size) * w.dtype.itemsize for w in weights)
    bytes_accessed = e_pad * in_pad * 2 + raw_w_bytes + e_pad * f_pad * out_itemsize
    cost = pl.CostEstimate(flops=int(flops), transcendentals=int(transcendentals),
                           bytes_accessed=int(bytes_accessed))

    return dict(x_in=x_in, weights=weights, tile=tile, e_pad=e_pad, n_blocks=n_blocks,
                in_pad=in_pad, f_pad=f_pad, f_out=f_out, num_edges=num_edges,
                n_hidden_layers=n_hidden_layers, gelu_dtype=gelu_dtype,
                out_dtype=out_dtype, vmem_limit=vmem_limit, cost=cost)


# ----------------------------------------------------------------------------
# Pallas wrapper: run the fused MLP once over num_edges rows, tile result per batch.
# ----------------------------------------------------------------------------
def edge_mlp_pallas(prep, batch_size):
    kernel = functools.partial(
        _edge_mlp_kernel, prep["n_hidden_layers"], prep["f_out"],
        prep["f_pad"] > prep["f_out"], prep["gelu_dtype"])

    def build_call(single_buffer_weights):
        in_specs = [pl.BlockSpec((prep["tile"], prep["in_pad"]), lambda i: (i, 0))]
        for wgt in prep["weights"]:
            if single_buffer_weights:
                # constant index_map -> double buffering buys nothing; reclaim the VMEM.
                spec = pl.BlockSpec(wgt.shape, lambda i: (0, 0), pipeline_mode=pl.Buffered(1))
            else:
                spec = pl.BlockSpec(wgt.shape, lambda i: (0, 0))
            in_specs.append(spec)
        return pl.pallas_call(
            kernel,
            out_shape=jax.ShapeDtypeStruct((prep["e_pad"], prep["f_pad"]), prep["out_dtype"]),
            grid_spec=pltpu.PrefetchScalarGridSpec(
                num_scalar_prefetch=0,
                grid=(prep["n_blocks"],),
                in_specs=in_specs,
                out_specs=pl.BlockSpec((prep["tile"], prep["f_pad"]), lambda i: (i, 0)),
            ),
            compiler_params=pltpu.CompilerParams(
                dimension_semantics=("parallel",),
                vmem_limit_bytes=prep["vmem_limit"],
            ),
            cost_estimate=prep["cost"],
        )

    try:
        out = build_call(True)(prep["x_in"], *prep["weights"])
    except Exception:
        # TODO(synk): pl.Buffered(1) single-buffering of resident weight blocks not supported on
        # this jax version — fall back to default double buffering.
        out = build_call(False)(prep["x_in"], *prep["weights"])

    # strip row / lane padding, then repeat per batch (pure HBM copy at full DMA bandwidth;
    # the MLP output is identical for every batch element).
    out = out[:prep["num_edges"], :prep["f_out"]]
    if batch_size > 1:
        out = jnp.tile(out, (batch_size, 1))
    return out


# ----------------------------------------------------------------------------
# GNNBaseMapper re-implementation (parameters built deterministically in-script)
# ----------------------------------------------------------------------------
class GNNBaseMapperPallas:
    def __init__(
        self,
        *,
        in_channels_src,
        in_channels_dst,
        hidden_dim,
        trainable_size,
        mlp_extra_layers,
        edge_attr,          # static sub-graph edge attributes, (num_edges, attr_dim)
        edge_index,         # (2, num_edges) int
        src_grid_size,
        dst_grid_size,
        key,
        out_dtype=jnp.float32,   # use jnp.bfloat16 if the downstream GNN block consumes bf16
    ):
        self.in_channels_src = in_channels_src
        self.in_channels_dst = in_channels_dst
        self.hidden_dim = hidden_dim

        self.edge_attr = edge_attr
        self.edge_index_base = edge_index
        self.edge_inc = jnp.asarray([[src_grid_size], [dst_grid_size]], dtype=jnp.int32)
        self.edge_dim = edge_attr.shape[1] + trainable_size

        num_edges = edge_attr.shape[0]
        keys = jax.random.split(key, 16)
        k = iter(keys)

        # TrainableTensor: learnable (num_edges, trainable_size)
        self.trainable = (
            jax.random.normal(next(k), (num_edges, trainable_size), jnp.float32) * 0.1
            if trainable_size > 0 else None
        )

        # emb_edges MLP (anemoi MLP: Linear(in,h)+act, (n_extra+1)x(Linear(h,h)+act),
        # Linear(h,h), LayerNorm(h)).  Master params in f32; bf16 padded copies built once below.
        self.n_hidden_layers = mlp_extra_layers + 1
        p = {}
        p["w_in"] = jax.random.normal(next(k), (self.edge_dim, hidden_dim), jnp.float32) / jnp.sqrt(self.edge_dim)
        p["b_in"] = jnp.zeros((1, hidden_dim), jnp.float32)
        for i in range(self.n_hidden_layers):
            p[f"w_h{i}"] = jax.random.normal(next(k), (hidden_dim, hidden_dim), jnp.float32) / jnp.sqrt(hidden_dim)
            p[f"b_h{i}"] = jnp.full((1, hidden_dim), 0.01 * (i + 1), jnp.float32)
        p["w_out"] = jax.random.normal(next(k), (hidden_dim, hidden_dim), jnp.float32) / jnp.sqrt(hidden_dim)
        p["b_out"] = jnp.zeros((1, hidden_dim), jnp.float32)
        p["ln_gamma"] = jnp.ones((1, hidden_dim), jnp.float32)
        p["ln_beta"] = jnp.zeros((1, hidden_dim), jnp.float32)
        self.mlp_params = p

        # generation-aware kernel config + one-time padded/cast kernel inputs.
        # NOTE: in a training loop this prep would live inside the jitted step (trainable and the
        # MLP weights are parameters); here (forward only) it is precomputed to avoid per-forward
        # cast/pad dispatches that serialize around the pallas_call.
        self.vmem_capacity, self.gelu_dtype, self.tile_rows = _tpu_hw_config()
        self._prep = prepare_edge_mlp_inputs(
            self.edge_attr, self.trainable, self.mlp_params, self.n_hidden_layers,
            tile_rows=self.tile_rows, vmem_capacity_bytes=self.vmem_capacity,
            gelu_dtype=self.gelu_dtype, out_dtype=out_dtype)

    # --- TrainableTensor.forward(x, batch_size) (kept for the pure-JAX reference path) ---
    def _trainable_tensor(self, x, batch_size):
        latent = [jnp.tile(x, (batch_size, 1))]
        if self.trainable is not None:
            latent.append(jnp.tile(self.trainable, (batch_size, 1)))
        return jnp.concatenate(latent, axis=-1)

    # --- GraphEdgeMixin._expand_edges ---
    def _expand_edges(self, edge_index, edge_inc, batch_size):
        return jnp.concatenate([edge_index + i * edge_inc for i in range(batch_size)], axis=1)

    def prepare_edges(self, size, batch_size):
        edge_index = self._expand_edges(self.edge_index_base, self.edge_inc, batch_size)
        # sort_edges_1hop_sharding / shard_tensor are identity without a model_comm_group.
        # TODO(synk): distributed sharding paths (model_comm_group) are not implemented.
        edge_attr = edge_mlp_pallas(self._prep, batch_size)
        return edge_attr, edge_index

    def pre_process(self, x, shard_shapes):
        shapes_src, shapes_dst = shard_shapes
        x_src, x_dst = x
        return x_src, x_dst, shapes_src, shapes_dst

    def post_process(self, x_dst, shapes_dst):
        return x_dst

    def forward(self, x, batch_size, shard_shapes):
        size = (sum(s[0] for s in shard_shapes[0]), sum(s[0] for s in shard_shapes[1]))
        edge_attr, edge_index = self.prepare_edges(size, batch_size)
        x_src, x_dst, shapes_src, shapes_dst = self.pre_process(x, shard_shapes)
        # TODO(synk): self.proc is NotImplemented in GNNBaseMapper (only subclasses define the
        # GraphConv processor block), so x_src/x_dst pass through unchanged here.
        x_dst = self.post_process(x_dst, shapes_dst)
        return (x_src, x_dst), edge_attr, edge_index


# ----------------------------------------------------------------------------
# Pure-JAX references for the edge MLP (correctness checks)
# ----------------------------------------------------------------------------
def edge_mlp_reference_f32(x, params, n_hidden_layers):
    """Full f32 math (PyTorch module semantics)."""
    h = x @ params["w_in"] + params["b_in"]
    h = _gelu_tanh(h)
    for i in range(n_hidden_layers):
        h = h @ params[f"w_h{i}"] + params[f"b_h{i}"]
        h = _gelu_tanh(h)
    y = h @ params["w_out"] + params["b_out"]
    mean = jnp.mean(y, axis=-1, keepdims=True)
    var = jnp.mean(jnp.square(y - mean), axis=-1, keepdims=True)
    y = (y - mean) * jax.lax.rsqrt(var + 1e-5)
    return y * params["ln_gamma"] + params["ln_beta"]


def edge_mlp_reference_matched(x, params, n_hidden_layers, gelu_dtype):
    """Mirrors the kernel math: bf16 matmul operands, f32 accumulate, GELU in gelu_dtype,
    two-pass LayerNorm in f32."""
    bf = jnp.bfloat16
    h = jnp.dot(x.astype(bf), params["w_in"].astype(bf),
                preferred_element_type=jnp.float32) + params["b_in"]
    h = _gelu_tanh(h.astype(gelu_dtype))
    for i in range(n_hidden_layers):
        h = jnp.dot(h.astype(bf), params[f"w_h{i}"].astype(bf),
                    preferred_element_type=jnp.float32) + params[f"b_h{i}"]
        h = _gelu_tanh(h.astype(gelu_dtype))
    y = jnp.dot(h.astype(bf), params["w_out"].astype(bf),
                preferred_element_type=jnp.float32) + params["b_out"]
    n = y.shape[-1]
    mean = jnp.sum(y, axis=-1, keepdims=True) / n
    d = y - mean
    var = jnp.sum(d * d, axis=-1, keepdims=True) / n
    y = d * jax.lax.rsqrt(var + 1e-5)
    return y * params["ln_gamma"] + params["ln_beta"]


if __name__ == "__main__":
    key = jax.random.PRNGKey(0)
    k_graph, k_attr, k_src, k_dst, k_model = jax.random.split(key, 5)

    # small synthetic config
    batch_size = 2
    in_channels_src = 8
    in_channels_dst = 8
    hidden_dim = 32
    trainable_size = 1
    mlp_extra_layers = 0
    num_edges = 32
    src_grid_size = 16
    dst_grid_size = 12

    # synthetic sub-graph: edge attributes (2 attrs of dims 2 and 1 concatenated) + edge_index
    edge_attr_static = jax.random.normal(k_attr, (num_edges, 3), jnp.float32)
    edge_index = jnp.stack(
        [
            jax.random.randint(k_graph, (num_edges,), 0, src_grid_size),
            jax.random.randint(jax.random.fold_in(k_graph, 1), (num_edges,), 0, dst_grid_size),
        ],
        axis=0,
    ).astype(jnp.int32)

    mapper = GNNBaseMapperPallas(
        in_channels_src=in_channels_src,
        in_channels_dst=in_channels_dst,
        hidden_dim=hidden_dim,
        trainable_size=trainable_size,
        mlp_extra_layers=mlp_extra_layers,
        edge_attr=edge_attr_static,
        edge_index=edge_index,
        src_grid_size=src_grid_size,
        dst_grid_size=dst_grid_size,
        key=k_model,
    )

    # node inputs (already "sharded" trivially: one shard each)
    x_src = jax.random.normal(k_src, (batch_size * src_grid_size, in_channels_src), jnp.float32)
    x_dst = jax.random.normal(k_dst, (batch_size * dst_grid_size, in_channels_dst), jnp.float32)
    shard_shapes = ((x_src.shape,), (x_dst.shape,))

    (x_src_out, x_dst_out), edge_attr_emb, edge_index_exp = mapper.forward(
        (x_src, x_dst), batch_size, shard_shapes
    )
    jax.block_until_ready((x_src_out, x_dst_out, edge_attr_emb, edge_index_exp))

    # verify the Pallas hot path against plain-JAX references over the full bs*E rows
    # (also checks the batch tiling of the kernel output).
    edge_attr_in = mapper._trainable_tensor(mapper.edge_attr, batch_size)
    ref_matched = edge_mlp_reference_matched(edge_attr_in, mapper.mlp_params,
                                             mapper.n_hidden_layers, mapper.gelu_dtype)
    ref_f32 = edge_mlp_reference_f32(edge_attr_in, mapper.mlp_params, mapper.n_hidden_layers)

    assert edge_attr_emb.shape == (batch_size * num_edges, hidden_dim)
    assert edge_index_exp.shape == (2, batch_size * num_edges)
    # tight check against the precision-matched (bf16 matmul / kernel GELU dtype) reference
    assert jnp.allclose(edge_attr_emb, ref_matched, atol=2e-2, rtol=2e-2), \
        "edge MLP mismatch vs precision-matched reference"
    # looser check against the full-f32 module semantics (bf16 quantization tolerance)
    assert jnp.allclose(edge_attr_emb, ref_f32, atol=1e-1, rtol=1e-1), \
        "edge MLP mismatch vs f32 reference"

    print("KERNEL_OK")
</pallas_src>

<mosaic_0001>
module attributes {stable_mosaic.version = 11 : i64} {
  func.func @_edge_mlp_kernel(%arg0: i32, %arg1: memref<16x8xbf16, #tpu.memory_space<vmem>>, %arg2: memref<8x32xbf16, #tpu.memory_space<vmem>>, %arg3: memref<1x32xf32, #tpu.memory_space<vmem>>, %arg4: memref<32x32xbf16, #tpu.memory_space<vmem>>, %arg5: memref<1x32xf32, #tpu.memory_space<vmem>>, %arg6: memref<32x128xbf16, #tpu.memory_space<vmem>>, %arg7: memref<1x128xf32, #tpu.memory_space<vmem>>, %arg8: memref<1x128xf32, #tpu.memory_space<vmem>>, %arg9: memref<1x128xf32, #tpu.memory_space<vmem>>, %arg10: memref<16x128xf32, #tpu.memory_space<vmem>>) attributes {dimension_semantics = [#tpu.dimension_semantics<parallel>], iteration_bounds = array<i64: 2>, scalar_prefetch = 0 : i64, scratch_operands = 0 : i64, tpu.core_type = #tpu.core_type<tc>, window_params = [{transform_indices = @transform_0, window_bounds = array<i64: 16, 8>}, {pipeline_mode = #tpu.pipeline_mode<synchronous>, transform_indices = @transform_1, window_bounds = array<i64: 8, 32>}, {pipeline_mode = #tpu.pipeline_mode<synchronous>, transform_indices = @transform_2, window_bounds = array<i64: 1, 32>}, {pipeline_mode = #tpu.pipeline_mode<synchronous>, transform_indices = @transform_3, window_bounds = array<i64: 32, 32>}, {pipeline_mode = #tpu.pipeline_mode<synchronous>, transform_indices = @transform_4, window_bounds = array<i64: 1, 32>}, {pipeline_mode = #tpu.pipeline_mode<synchronous>, transform_indices = @transform_5, window_bounds = array<i64: 32, 128>}, {pipeline_mode = #tpu.pipeline_mode<synchronous>, transform_indices = @transform_6, window_bounds = array<i64: 1, 128>}, {pipeline_mode = #tpu.pipeline_mode<synchronous>, transform_indices = @transform_7, window_bounds = array<i64: 1, 128>}, {pipeline_mode = #tpu.pipeline_mode<synchronous>, transform_indices = @transform_8, window_bounds = array<i64: 1, 128>}, {transform_indices = @transform_9, window_bounds = array<i64: 16, 128>}]} {
    %c0 = arith.constant 0 : index
    %c0_0 = arith.constant 0 : index
    %0 = vector.load %arg1[%c0, %c0_0] : memref<16x8xbf16, #tpu.memory_space<vmem>>, vector<16x8xbf16>
    %c0_1 = arith.constant 0 : index
    %c0_2 = arith.constant 0 : index
    %1 = vector.load %arg2[%c0_1, %c0_2] : memref<8x32xbf16, #tpu.memory_space<vmem>>, vector<8x32xbf16>
    %cst = arith.constant dense<0.000000e+00> : vector<16x32xf32>
    %2 = tpu.matmul %0, %1, %cst {dimension_numbers = #tpu.dot_dimension_numbers<[1], [0], [0], [1], [0, 0, 1, 1], [], []>} : vector<16x8xbf16>, vector<8x32xbf16>, vector<16x32xf32> -> vector<16x32xf32>
    %c0_3 = arith.constant 0 : index
    %c0_4 = arith.constant 0 : index
    %3 = vector.load %arg3[%c0_3, %c0_4] : memref<1x32xf32, #tpu.memory_space<vmem>>, vector<1x32xf32>
    %4 = vector.broadcast %3 : vector<1x32xf32> to vector<16x32xf32>
    %5 = arith.addf %2, %4 : vector<16x32xf32>
    %cst_5 = arith.constant 5.000000e-01 : f32
    %6 = vector.broadcast %cst_5 : f32 to vector<16x32xf32>
    %7 = arith.mulf %6, %5 : vector<16x32xf32>
    %cst_6 = arith.constant 0.797884583 : f32
    %8 = vector.broadcast %cst_6 : f32 to vector<16x32xf32>
    %9 = arith.mulf %8, %5 : vector<16x32xf32>
    %cst_7 = arith.constant 4.471500e-02 : f32
    %10 = vector.broadcast %cst_7 : f32 to vector<16x32xf32>
    %11 = arith.mulf %10, %5 : vector<16x32xf32>
    %12 = arith.mulf %11, %5 : vector<16x32xf32>
    %cst_8 = arith.constant 1.000000e+00 : f32
    %13 = vector.broadcast %cst_8 : f32 to vector<16x32xf32>
    %14 = arith.addf %13, %12 : vector<16x32xf32>
    %15 = arith.mulf %9, %14 : vector<16x32xf32>
    %16 = math.tanh %15 : vector<16x32xf32>
    %cst_9 = arith.constant 1.000000e+00 : f32
    %17 = vector.broadcast %cst_9 : f32 to vector<16x32xf32>
    %18 = arith.addf %17, %16 : vector<16x32xf32>
    %19 = arith.mulf %7, %18 : vector<16x32xf32>
    %20 = arith.truncf %19 : vector<16x32xf32> to vector<16x32xbf16>
    %c0_10 = arith.constant 0 : index
    %c0_11 = arith.constant 0 : index
    %21 = vector.load %arg4[%c0_10, %c0_11] : memref<32x32xbf16, #tpu.memory_space<vmem>>, vector<32x32xbf16>
    %cst_12 = arith.constant dense<0.000000e+00> : vector<16x32xf32>
    %22 = tpu.matmul %20, %21, %cst_12 {dimension_numbers = #tpu.dot_dimension_numbers<[1], [0], [0], [1], [0, 0, 1, 1], [], []>} : vector<16x32xbf16>, vector<32x32xbf16>, vector<16x32xf32> -> vector<16x32xf32>
    %c0_13 = arith.constant 0 : index
    %c0_14 = arith.constant 0 : index
    %23 = vector.load %arg5[%c0_13, %c0_14] : memref<1x32xf32, #tpu.memory_space<vmem>>, vector<1x32xf32>
    %24 = vector.broadcast %23 : vector<1x32xf32> to vector<16x32xf32>
    %25 = arith.addf %22, %24 : vector<16x32xf32>
    %cst_15 = arith.constant 5.000000e-01 : f32
    %26 = vector.broadcast %cst_15 : f32 to vector<16x32xf32>
    %27 = arith.mulf %26, %25 : vector<16x32xf32>
    %cst_16 = arith.constant 0.797884583 : f32
    %28 = vector.broadcast %cst_16 : f32 to vector<16x32xf32>
    %29 = arith.mulf %28, %25 : vector<16x32xf32>
    %cst_17 = arith.constant 4.471500e-02 : f32
    %30 = vector.broadcast %cst_17 : f32 to vector<16x32xf32>
    %31 = arith.mulf %30, %25 : vector<16x32xf32>
    %32 = arith.mulf %31, %25 : vector<16x32xf32>
    %cst_18 = arith.constant 1.000000e+00 : f32
    %33 = vector.broadcast %cst_18 : f32 to vector<16x32xf32>
    %34 = arith.addf %33, %32 : vector<16x32xf32>
    %35 = arith.mulf %29, %34 : vector<16x32xf32>
    %36 = math.tanh %35 : vector<16x32xf32>
    %cst_19 = arith.constant 1.000000e+00 : f32
    %37 = vector.broadcast %cst_19 : f32 to vector<16x32xf32>
    %38 = arith.addf %37, %36 : vector<16x32xf32>
    %39 = arith.mulf %27, %38 : vector<16x32xf32>
    %40 = arith.truncf %39 : vector<16x32xf32> to vector<16x32xbf16>
    %c0_20 = arith.constant 0 : index
    %c0_21 = arith.constant 0 : index
    %41 = vector.load %arg6[%c0_20, %c0_21] : memref<32x128xbf16, #tpu.memory_space<vmem>>, vector<32x128xbf16>
    %cst_22 = arith.constant dense<0.000000e+00> : vector<16x128xf32>
    %42 = tpu.matmul %40, %41, %cst_22 {dimension_numbers = #tpu.dot_dimension_numbers<[1], [0], [0], [1], [0, 0, 1, 1], [], []>} : vector<16x32xbf16>, vector<32x128xbf16>, vector<16x128xf32> -> vector<16x128xf32>
    %c0_23 = arith.constant 0 : index
    %c0_24 = arith.constant 0 : index
    %43 = vector.load %arg7[%c0_23, %c0_24] : memref<1x128xf32, #tpu.memory_space<vmem>>, vector<1x128xf32>
    %44 = vector.broadcast %43 : vector<1x128xf32> to vector<16x128xf32>
    %45 = arith.addf %42, %44 : vector<16x128xf32>
    %cst_25 = arith.constant dense<0.000000e+00> : vector<16xf32>
    %46 = vector.multi_reduction <add>, %45, %cst_25 [1] : vector<16x128xf32> to vector<16xf32>
    %47 = vector.shape_cast %46 : vector<16xf32> to vector<16x1xf32>
    %cst_26 = arith.constant 3.125000e-02 : f32
    %48 = vector.broadcast %cst_26 : f32 to vector<16x1xf32>
    %49 = arith.mulf %47, %48 : vector<16x1xf32>
    %50 = vector.broadcast %49 : vector<16x1xf32> to vector<16x128xf32>
    %51 = arith.subf %45, %50 : vector<16x128xf32>
    %52 = tpu.iota {dimensions = array<i32: 1>} : vector<16x128xi32>
    %c32_i32 = arith.constant 32 : i32
    %53 = vector.broadcast %c32_i32 : i32 to vector<16x128xi32>
    %54 = arith.cmpi slt, %52, %53 : vector<16x128xi32>
    %cst_27 = arith.constant 0.000000e+00 : f32
    %55 = vector.broadcast %cst_27 : f32 to vector<16x128xf32>
    %56 = arith.select %54, %51, %55 : vector<16x128xi1>, vector<16x128xf32>
    %57 = arith.mulf %56, %56 : vector<16x128xf32>
    %cst_28 = arith.constant dense<0.000000e+00> : vector<16xf32>
    %58 = vector.multi_reduction <add>, %57, %cst_28 [1] : vector<16x128xf32> to vector<16xf32>
    %59 = vector.shape_cast %58 : vector<16xf32> to vector<16x1xf32>
    %cst_29 = arith.constant 3.125000e-02 : f32
    %60 = vector.broadcast %cst_29 : f32 to vector<16x1xf32>
    %61 = arith.mulf %59, %60 : vector<16x1xf32>
    %cst_30 = arith.constant 9.99999974E-6 : f32
    %62 = vector.broadcast %cst_30 : f32 to vector<16x1xf32>
    %63 = arith.addf %61, %62 : vector<16x1xf32>
    %64 = math.rsqrt %63 : vector<16x1xf32>
    %65 = vector.broadcast %64 : vector<16x1xf32> to vector<16x128xf32>
    %66 = arith.mulf %56, %65 : vector<16x128xf32>
    %c0_31 = arith.constant 0 : index
    %c0_32 = arith.constant 0 : index
    %67 = vector.load %arg8[%c0_31, %c0_32] : memref<1x128xf32, #tpu.memory_space<vmem>>, vector<1x128xf32>
    %68 = vector.broadcast %67 : vector<1x128xf32> to vector<16x128xf32>
    %69 = arith.mulf %66, %68 : vector<16x128xf32>
    %c0_33 = arith.constant 0 : index
    %c0_34 = arith.constant 0 : index
    %70 = vector.load %arg9[%c0_33, %c0_34] : memref<1x128xf32, #tpu.memory_space<vmem>>, vector<1x128xf32>
    %71 = vector.broadcast %70 : vector<1x128xf32> to vector<16x128xf32>
    %72 = arith.addf %69, %71 : vector<16x128xf32>
    %c0_35 = arith.constant 0 : index
    %c0_36 = arith.constant 0 : index
    %73 = vector.load %arg10[%c0_35, %c0_36] : memref<16x128xf32, #tpu.memory_space<vmem>>, vector<16x128xf32>
    tpu.vector_store %arg10[%c0_35, %c0_36], %72 {strides = array<i32>} : memref<16x128xf32, #tpu.memory_space<vmem>>, vector<16x128xf32>,
    return
  }
  func.func @transform_0(%arg0: i32) -> (i32, i32) {
    %c0_i32 = arith.constant 0 : i32
    %c0_i32_0 = arith.constant 0 : i32
    return %arg0, %c0_i32 : i32, i32
  }
  func.func @transform_1(%arg0: i32) -> (i32, i32) {
    %c0_i32 = arith.constant 0 : i32
    %c0_i32_0 = arith.constant 0 : i32
    %c0_i32_1 = arith.constant 0 : i32
    return %c0_i32, %c0_i32_0 : i32, i32
  }
  func.func @transform_2(%arg0: i32) -> (i32, i32) {
    %c0_i32 = arith.constant 0 : i32
    %c0_i32_0 = arith.constant 0 : i32
    %c0_i32_1 = arith.constant 0 : i32
    return %c0_i32, %c0_i32_0 : i32, i32
  }
  func.func @transform_3(%arg0: i32) -> (i32, i32) {
    %c0_i32 = arith.constant 0 : i32
    %c0_i32_0 = arith.constant 0 : i32
    %c0_i32_1 = arith.constant 0 : i32
    return %c0_i32, %c0_i32_0 : i32, i32
  }
  func.func @transform_4(%arg0: i32) -> (i32, i32) {
    %c0_i32 = arith.constant 0 : i32
    %c0_i32_0 = arith.constant 0 : i32
    %c0_i32_1 = arith.constant 0 : i32
    return %c0_i32, %c0_i32_0 : i32, i32
  }
  func.func @transform_5(%arg0: i32) -> (i32, i32) {
    %c0_i32 = arith.constant 0 : i32
    %c0_i32_0 = arith.constant 0 : i32
    %c0_i32_1 = arith.constant 0 : i32
    return %c0_i32, %c0_i32_0 : i32, i32
  }
  func.func @transform_6(%arg0: i32) -> (i32, i32) {
    %c0_i32 = arith.constant 0 : i32
    %c0_i32_0 = arith.constant 0 : i32
    %c0_i32_1 = arith.constant 0 : i32
    return %c0_i32, %c0_i32_0 : i32, i32
  }
  func.func @transform_7(%arg0: i32) -> (i32, i32) {
    %c0_i32 = arith.constant 0 : i32
    %c0_i32_0 = arith.constant 0 : i32
    %c0_i32_1 = arith.constant 0 : i32
    return %c0_i32, %c0_i32_0 : i32, i32
  }
  func.func @transform_8(%arg0: i32) -> (i32, i32) {
    %c0_i32 = arith.constant 0 : i32
    %c0_i32_0 = arith.constant 0 : i32
    %c0_i32_1 = arith.constant 0 : i32
    return %c0_i32, %c0_i32_0 : i32, i32
  }
  func.func @transform_9(%arg0: i32) -> (i32, i32) {
    %c0_i32 = arith.constant 0 : i32
    %c0_i32_0 = arith.constant 0 : i32
    return %arg0, %c0_i32 : i32, i32
  }
}

module attributes {stable_mosaic.version = 11 : i64} {
  func.func @_edge_mlp_kernel(%arg0: i32, %arg1: memref<16x8xbf16, #tpu.memory_space<vmem>>, %arg2: memref<8x32xbf16, #tpu.memory_space<vmem>>, %arg3: memref<1x32xf32, #tpu.memory_space<vmem>>, %arg4: memref<32x32xbf16, #tpu.memory_space<vmem>>, %arg5: memref<1x32xf32, #tpu.memory_space<vmem>>, %arg6: memref<32x128xbf16, #tpu.memory_space<vmem>>, %arg7: memref<1x128xf32, #tpu.memory_space<vmem>>, %arg8: memref<1x128xf32, #tpu.memory_space<vmem>>, %arg9: memref<1x128xf32, #tpu.memory_space<vmem>>, %arg10: memref<16x128xf32, #tpu.memory_space<vmem>>) attributes {dimension_semantics = [#tpu.dimension_semantics<parallel>], iteration_bounds = array<i64: 2>, scalar_prefetch = 0 : i64, scratch_operands = 0 : i64, tpu.core_type = #tpu.core_type<tc>, window_params = [{transform_indices = @transform_0, window_bounds = array<i64: 16, 8>}, {pipeline_mode = #tpu.pipeline_mode<synchronous>, transform_indices = @transform_1, window_bounds = array<i64: 8, 32>}, {pipeline_mode = #tpu.pipeline_mode<synchronous>, transform_indices = @transform_2, window_bounds = array<i64: 1, 32>}, {pipeline_mode = #tpu.pipeline_mode<synchronous>, transform_indices = @transform_3, window_bounds = array<i64: 32, 32>}, {pipeline_mode = #tpu.pipeline_mode<synchronous>, transform_indices = @transform_4, window_bounds = array<i64: 1, 32>}, {pipeline_mode = #tpu.pipeline_mode<synchronous>, transform_indices = @transform_5, window_bounds = array<i64: 32, 128>}, {pipeline_mode = #tpu.pipeline_mode<synchronous>, transform_indices = @transform_6, window_bounds = array<i64: 1, 128>}, {pipeline_mode = #tpu.pipeline_mode<synchronous>, transform_indices = @transform_7, window_bounds = array<i64: 1, 128>}, {pipeline_mode = #tpu.pipeline_mode<synchronous>, transform_indices = @transform_8, window_bounds = array<i64: 1, 128>}, {transform_indices = @transform_9, window_bounds = array<i64: 16, 128>}]} {
    %c0 = arith.constant 0 : index
    %c0_0 = arith.constant 0 : index
    %0 = vector.load %arg1[%c0, %c0_0] : memref<16x8xbf16, #tpu.memory_space<vmem>>, vector<16x8xbf16>
    %c0_1 = arith.constant 0 : index
    %c0_2 = arith.constant 0 : index
    %1 = vector.load %arg2[%c0_1, %c0_2] : memref<8x32xbf16, #tpu.memory_space<vmem>>, vector<8x32xbf16>
    %cst = arith.constant dense<0.000000e+00> : vector<16x32xf32>
    %2 = tpu.matmul %0, %1, %cst {dimension_numbers = #tpu.dot_dimension_numbers<[1], [0], [0], [1], [0, 0, 1, 1], [], []>} : vector<16x8xbf16>, vector<8x32xbf16>, vector<16x32xf32> -> vector<16x32xf32>
    %c0_3 = arith.constant 0 : index
    %c0_4 = arith.constant 0 : index
    %3 = vector.load %arg3[%c0_3, %c0_4] : memref<1x32xf32, #tpu.memory_space<vmem>>, vector<1x32xf32>
    %4 = vector.broadcast %3 : vector<1x32xf32> to vector<16x32xf32>
    %5 = arith.addf %2, %4 : vector<16x32xf32>
    %cst_5 = arith.constant 5.000000e-01 : f32
    %6 = vector.broadcast %cst_5 : f32 to vector<16x32xf32>
    %7 = arith.mulf %6, %5 : vector<16x32xf32>
    %cst_6 = arith.constant 0.797884583 : f32
    %8 = vector.broadcast %cst_6 : f32 to vector<16x32xf32>
    %9 = arith.mulf %8, %5 : vector<16x32xf32>
    %cst_7 = arith.constant 4.471500e-02 : f32
    %10 = vector.broadcast %cst_7 : f32 to vector<16x32xf32>
    %11 = arith.mulf %10, %5 : vector<16x32xf32>
    %12 = arith.mulf %11, %5 : vector<16x32xf32>
    %cst_8 = arith.constant 1.000000e+00 : f32
    %13 = vector.broadcast %cst_8 : f32 to vector<16x32xf32>
    %14 = arith.addf %13, %12 : vector<16x32xf32>
    %15 = arith.mulf %9, %14 : vector<16x32xf32>
    %16 = math.tanh %15 : vector<16x32xf32>
    %cst_9 = arith.constant 1.000000e+00 : f32
    %17 = vector.broadcast %cst_9 : f32 to vector<16x32xf32>
    %18 = arith.addf %17, %16 : vector<16x32xf32>
    %19 = arith.mulf %7, %18 : vector<16x32xf32>
    %20 = arith.truncf %19 : vector<16x32xf32> to vector<16x32xbf16>
    %c0_10 = arith.constant 0 : index
    %c0_11 = arith.constant 0 : index
    %21 = vector.load %arg4[%c0_10, %c0_11] : memref<32x32xbf16, #tpu.memory_space<vmem>>, vector<32x32xbf16>
    %cst_12 = arith.constant dense<0.000000e+00> : vector<16x32xf32>
    %22 = tpu.matmul %20, %21, %cst_12 {dimension_numbers = #tpu.dot_dimension_numbers<[1], [0], [0], [1], [0, 0, 1, 1], [], []>} : vector<16x32xbf16>, vector<32x32xbf16>, vector<16x32xf32> -> vector<16x32xf32>
    %c0_13 = arith.constant 0 : index
    %c0_14 = arith.constant 0 : index
    %23 = vector.load %arg5[%c0_13, %c0_14] : memref<1x32xf32, #tpu.memory_space<vmem>>, vector<1x32xf32>
    %24 = vector.broadcast %23 : vector<1x32xf32> to vector<16x32xf32>
    %25 = arith.addf %22, %24 : vector<16x32xf32>
    %cst_15 = arith.constant 5.000000e-01 : f32
    %26 = vector.broadcast %cst_15 : f32 to vector<16x32xf32>
    %27 = arith.mulf %26, %25 : vector<16x32xf32>
    %cst_16 = arith.constant 0.797884583 : f32
    %28 = vector.broadcast %cst_16 : f32 to vector<16x32xf32>
    %29 = arith.mulf %28, %25 : vector<16x32xf32>
    %cst_17 = arith.constant 4.471500e-02 : f32
    %30 = vector.broadcast %cst_17 : f32 to vector<16x32xf32>
    %31 = arith.mulf %30, %25 : vector<16x32xf32>
    %32 = arith.mulf %31, %25 : vector<16x32xf32>
    %cst_18 = arith.constant 1.000000e+00 : f32
    %33 = vector.broadcast %cst_18 : f32 to vector<16x32xf32>
    %34 = arith.addf %33, %32 : vector<16x32xf32>
    %35 = arith.mulf %29, %34 : vector<16x32xf32>
    %36 = math.tanh %35 : vector<16x32xf32>
    %cst_19 = arith.constant 1.000000e+00 : f32
    %37 = vector.broadcast %cst_19 : f32 to vector<16x32xf32>
    %38 = arith.addf %37, %36 : vector<16x32xf32>
    %39 = arith.mulf %27, %38 : vector<16x32xf32>
    %40 = arith.truncf %39 : vector<16x32xf32> to vector<16x32xbf16>
    %c0_20 = arith.constant 0 : index
    %c0_21 = arith.constant 0 : index
    %41 = vector.load %arg6[%c0_20, %c0_21] : memref<32x128xbf16, #tpu.memory_space<vmem>>, vector<32x128xbf16>
    %cst_22 = arith.constant dense<0.000000e+00> : vector<16x128xf32>
    %42 = tpu.matmul %40, %41, %cst_22 {dimension_numbers = #tpu.dot_dimension_numbers<[1], [0], [0], [1], [0, 0, 1, 1], [], []>} : vector<16x32xbf16>, vector<32x128xbf16>, vector<16x128xf32> -> vector<16x128xf32>
    %c0_23 = arith.constant 0 : index
    %c0_24 = arith.constant 0 : index
    %43 = vector.load %arg7[%c0_23, %c0_24] : memref<1x128xf32, #tpu.memory_space<vmem>>, vector<1x128xf32>
    %44 = vector.broadcast %43 : vector<1x128xf32> to vector<16x128xf32>
    %45 = arith.addf %42, %44 : vector<16x128xf32>
    %cst_25 = arith.constant dense<0.000000e+00> : vector<16xf32>
    %46 = vector.multi_reduction <add>, %45, %cst_25 [1] : vector<16x128xf32> to vector<16xf32>
    %47 = vector.shape_cast %46 : vector<16xf32> to vector<16x1xf32>
    %cst_26 = arith.constant 3.125000e-02 : f32
    %48 = vector.broadcast %cst_26 : f32 to vector<16x1xf32>
    %49 = arith.mulf %47, %48 : vector<16x1xf32>
    %50 = vector.broadcast %49 : vector<16x1xf32> to vector<16x128xf32>
    %51 = arith.subf %45, %50 : vector<16x128xf32>
    %52 = tpu.iota {dimensions = array<i32: 1>} : vector<16x128xi32>
    %c32_i32 = arith.constant 32 : i32
    %53 = vector.broadcast %c32_i32 : i32 to vector<16x128xi32>
    %54 = arith.cmpi slt, %52, %53 : vector<16x128xi32>
    %cst_27 = arith.constant 0.000000e+00 : f32
    %55 = vector.broadcast %cst_27 : f32 to vector<16x128xf32>
    %56 = arith.select %54, %51, %55 : vector<16x128xi1>, vector<16x128xf32>
    %57 = arith.mulf %56, %56 : vector<16x128xf32>
    %cst_28 = arith.constant dense<0.000000e+00> : vector<16xf32>
    %58 = vector.multi_reduction <add>, %57, %cst_28 [1] : vector<16x128xf32> to vector<16xf32>
    %59 = vector.shape_cast %58 : vector<16xf32> to vector<16x1xf32>
    %cst_29 = arith.constant 3.125000e-02 : f32
    %60 = vector.broadcast %cst_29 : f32 to vector<16x1xf32>
    %61 = arith.mulf %59, %60 : vector<16x1xf32>
    %cst_30 = arith.constant 9.99999974E-6 : f32
    %62 = vector.broadcast %cst_30 : f32 to vector<16x1xf32>
    %63 = arith.addf %61, %62 : vector<16x1xf32>
    %64 = math.rsqrt %63 : vector<16x1xf32>
    %65 = vector.broadcast %64 : vector<16x1xf32> to vector<16x128xf32>
    %66 = arith.mulf %56, %65 : vector<16x128xf32>
    %c0_31 = arith.constant 0 : index
    %c0_32 = arith.constant 0 : index
    %67 = vector.load %arg8[%c0_31, %c0_32] : memref<1x128xf32, #tpu.memory_space<vmem>>, vector<1x128xf32>
    %68 = vector.broadcast %67 : vector<1x128xf32> to vector<16x128xf32>
    %69 = arith.mulf %66, %68 : vector<16x128xf32>
    %c0_33 = arith.constant 0 : index
    %c0_34 = arith.constant 0 : index
    %70 = vector.load %arg9[%c0_33, %c0_34] : memref<1x128xf32, #tpu.memory_space<vmem>>, vector<1x128xf32>
    %71 = vector.broadcast %70 : vector<1x128xf32> to vector<16x128xf32>
    %72 = arith.addf %69, %71 : vector<16x128xf32>
    %c0_35 = arith.constant 0 : index
    %c0_36 = arith.constant 0 : index
    %73 = vector.load %arg10[%c0_35, %c0_36] : memref<16x128xf32, #tpu.memory_space<vmem>>, vector<16x128xf32>
    tpu.vector_store %arg10[%c0_35, %c0_36], %72 {strides = array<i32>} : memref<16x128xf32, #tpu.memory_space<vmem>>, vector<16x128xf32>,
    return
  }
  func.func @transform_0(%arg0: i32) -> (i32, i32) {
    %c0_i32 = arith.constant 0 : i32
    %c0_i32_0 = arith.constant 0 : i32
    return %arg0, %c0_i32 : i32, i32
  }
  func.func @transform_1(%arg0: i32) -> (i32, i32) {
    %c0_i32 = arith.constant 0 : i32
    %c0_i32_0 = arith.constant 0 : i32
    %c0_i32_1 = arith.constant 0 : i32
    return %c0_i32, %c0_i32_0 : i32, i32
  }
  func.func @transform_2(%arg0: i32) -> (i32, i32) {
    %c0_i32 = arith.constant 0 : i32
    %c0_i32_0 = arith.constant 0 : i32
    %c0_i32_1 = arith.constant 0 : i32
    return %c0_i32, %c0_i32_0 : i32, i32
  }
  func.func @transform_3(%arg0: i32) -> (i32, i32) {
    %c0_i32 = arith.constant 0 : i32
    %c0_i32_0 = arith.constant 0 : i32
    %c0_i32_1 = arith.constant 0 : i32
    return %c0_i32, %c0_i32_0 : i32, i32
  }
  func.func @transform_4(%arg0: i32) -> (i32, i32) {
    %c0_i32 = arith.constant 0 : i32
    %c0_i32_0 = arith.constant 0 : i32
    %c0_i32_1 = arith.constant 0 : i32
    return %c0_i32, %c0_i32_0 : i32, i32
  }
  func.func @transform_5(%arg0: i32) -> (i32, i32) {
    %c0_i32 = arith.constant 0 : i32
    %c0_i32_0 = arith.constant 0 : i32
    %c0_i32_1 = arith.constant 0 : i32
    return %c0_i32, %c0_i32_0 : i32, i32
  }
  func.func @transform_6(%arg0: i32) -> (i32, i32) {
    %c0_i32 = arith.constant 0 : i32
    %c0_i32_0 = arith.constant 0 : i32
    %c0_i32_1 = arith.constant 0 : i32
    return %c0_i32, %c0_i32_0 : i32, i32
  }
  func.func @transform_7(%arg0: i32) -> (i32, i32) {
    %c0_i32 = arith.constant 0 : i32
    %c0_i32_0 = arith.constant 0 : i32
    %c0_i32_1 = arith.constant 0 : i32
    return %c0_i32, %c0_i32_0 : i32, i32
  }
  func.func @transform_8(%arg0: i32) -> (i32, i32) {
    %c0_i32 = arith.constant 0 : i32
    %c0_i32_0 = arith.constant 0 : i32
    %c0_i32_1 = arith.constant 0 : i32
    return %c0_i32, %c0_i32_0 : i32, i32
  }
  func.func @transform_9(%arg0: i32) -> (i32, i32) {
    %c0_i32 = arith.constant 0 : i32
    %c0_i32_0 = arith.constant 0 : i32
    return %arg0, %c0_i32 : i32, i32
  }
}

</mosaic_0001>

<bundles_post_ra>
// kernel: tpu_custom_call.1
= control target key start
LH: loop header
LB: loop body
LE: loop exit
PB: predicated region body
PF: predicated region fallthrough
CT: control target
= control target key end

     0   :  { %14 = vsyncpa [#allocation3], 0  ;;  %s1151_s0 = inlined_call_operand.vmem [shape: bf16[32,8], index: 0, kind: input, shape index: {}]   ;;  %s1152_s1 = inlined_call_operand.vmem [shape: bf16[8,32], index: 1, kind: input, shape index: {}]   ;;  %s1153_s2 = inlined_call_operand.vmem [shape: f32[1,32], index: 2, kind: input, shape index: {}]   ;;  %s1154_s3 = inlined_call_operand.vmem [shape: bf16[32,32], index: 3, kind: input, shape index: {}]   ;;  %s1155_s4 = inlined_call_operand.vmem [shape: f32[1,32], index: 4, kind: input, shape index: {}]   ;;  %s1156_s5 = inlined_call_operand.hbm [shape: bf16[32,128], index: 5, kind: input, shape index: {}]   ;;  %s1157_s6 = inlined_call_operand.vmem [shape: f32[1,128], index: 6, kind: input, shape index: {}]   ;;  %s1158_s7 = inlined_call_operand.vmem [shape: f32[1,128], index: 7, kind: input, shape index: {}]   ;;  %s1159_s8 = inlined_call_operand.vmem [shape: f32[1,128], index: 8, kind: input, shape index: {}]   ;;  %s1160_s9 = inlined_call_operand.hbm [shape: f32[32,128], index: 9, kind: output, shape index: {}]  }
   0x1   :  { %15 = vsyncpa [#allocation4], 0 }
   0x2   :  { %17 = vsyncpa [#allocation4 + $0x1], 0  ;;  %s1003_s30 = smov 0   ;;  %s1005_s10 = smov 0  }
   0x3   :  { %s1007_s11 = smov 0   ;;  %s1009_s12 = smov 0  }
   0x4 LB: > { %s1024_s13 = sadd.s32 4294967295, %s943_s12   ;;  %s722_s14 = sadd.s32 4294967294, %s943_s12   ;;  %s943_s12 = sphi %s1009_s12, %s1168_s12   ;;  %s939_s11 = sphi %s1007_s11, %s1167_s11   ;;  %s935_s10 = sphi %s1005_s10, %s1166_s10   ;;  %s931_s30 = sphi %s1003_s30, %s1165_s30  }
   0x5   : > { %s1028_s15 = sadd.s32 1, %s943_s12   ;;  %s224_s16 = sadd.s32 1, %s939_s11 }
   0x6   : > { %s221_s17 = ssub.s32 %s943_s12, %s1028_s15  ;;  %p234_p0 = scmp.ne.s32.totalorder %s939_s11, %s935_s10 }
   0x7   : > { %p222_p1 = scmp.eq.s32.totalorder %s221_s17, 0  ;;  %p235_p2 = scmp.eq.s32.totalorder %s1024_s13, 1 }
   0x8   : > { %p240_p3 = scmp.ne.s32.totalorder %s935_s10, %s931_s30  ;;  %p241_p4 = scmp.eq.s32.totalorder %s722_s14, 1 }
   0x9   : > { %s1039_s18 = scalar_select %p222_p1, %s939_s11, %s224_s16  }
   0xa   : > { %p1041_p5 = por %p235_p2, %p234_p0  ;;  %p1045_p6 = por %p241_p4, %p240_p3 }
   0xb   : > { %p723_p7 = scmp.ge.s32.totalorder %s943_s12, 1  ;;  %p248_p8 = scmp.lt.s32.totalorder %s943_s12, 3 }
   0xc   : > { %s1162_s20 = scalar_select %p1045_p6, 1, 0 }
   0xd   : > { %p794_p9 = scmp.eq.s32.totalorder %s1024_s13, 0  ;;  %p1052_p10 = pnand %p723_p7, %p248_p8 }
   0xe   : > { %s945_s22 = smov [#allocation2]  }
   0xf   : > { %s272_s23 = sshll.u32 %s945_s22, 4  ;;  %p786_p11 = pneg %p1052_p10  ;;  %s273_s23 = int_to_ptr.vmem [resolvable:$true] %s272_s23 }
  0x10   : > { %s864_s24 = scalar_lea.vmem %s273_s23, 256  ;;  %p872_p3 = scmp.lt.s32.totalorder %s273_s23, %s273_s23 }
  0x11   : > { %p787_p12 = pnand %p794_p9, %p786_p11  ;;  %p865_p0 = scmp.ne.s32.totalorder %s273_s23, %s864_s24 }
  0x12   : > { %p873_p4 = scmp.lt.s32.totalorder %s864_s24, %s864_s24 }
  0x13   : > { %p855_p13 = pneg %p787_p12 }
  0x14   : > { %p874_p6 = por %p873_p4, %p872_p3 }
  0x15   : > { %p867_p1 = pnand %p865_p0, %p855_p13 }
  0x17   : > { %p868_p2 = pneg %p867_p1 }
  0x19   : > { %p875_p7 = pnand %p874_p6, %p868_p2 }
  0x1b   : > { %878 = shalt.err (!%p875_p7)
}
  0x1c   : > { %s946_s25 = smov 64   ;;  %s947_s26 = smov 4  }
  0x1d   : > { %789 = dma.hbm_to_vmem [thread:$0]  (!%p787_p12), %s1156_s5, 256, %s273_s23, [#allocation3], %s946_s25, %s946_s25, %s947_s26  }
  0x1e   : > { %306 = sbr.rel (%p1052_p10) target bundleno = 1017 (0x3f9), region = 56 }
  0x23   : > { %922 = dma.done.wait (%p794_p9), [#allocation3], 256  }
  0x24   : > { %924 = vsyncadd (%p794_p9), [#allocation3], 4294967040  ;;  %s729_s29 = sshll.u32 %s1024_s13, 1  ;;  %v948_v0 = vmov 0.0   ;;  %vm949_vm0 = vmmov 0   ;;  %vm369_vm1 = vcmask 1043456  }
  0x25   : > { %758 = vmatprep.subr.bf16.mxu0 %v948_v0  ;;  %760 = vmatprep.mubr.msk.bf16.mxu0 %vm949_vm0, %v948_v0  ;;  %p343_p6 = scmp.lt.s32.totalorder %s729_s29, 3  ;;  %v352_v1 = vld [vmem:[%s1152_s1] sm:$0xf]  ;;  %vm365_vm2 = vcmask 64512   ;;  %v837_v4 = vld [vmem:[%s1154_s3 + $0x8] sm:$0xff]   ;;  %vm456_vm3 = vcmask 261120  }
  0x26   : > { %764 = vmatprep.subr.bf16.mxu1 %v948_v0  ;;  %768 = vmatprep.mubr.msk.bf16.mxu1 %vm949_vm0, %v948_v0  ;;  %v371_v2 = vsel %vm369_vm1, %v352_v1, 0  ;;  %v838_v5 = vld [vmem:[%s1154_s3] sm:$0xff]   ;;  %v839_v32 = vld [vmem:[#allocation2 + $0x8] sm:$0xff]   ;;  %s339_s22 = sand.u32 1, %s935_s10   ;;  %s749_s28 = sshll.u32 %s1024_s13, 8 }
  0x27   : > { %s1170_s29 = smov (!%p343_p6, %s729_s29), 3  ;;  %759 = vmatpush3.bf16.msra.mxu0 %v371_v2  ;;  %765 = vmatpush3.bf16.msra.mxu1 %v837_v4  ;;  %v731_v6 = vld [vmem:[%s1153_s2] ss:$0 sm:$0xff]  ;;  %s728_s25 = sshll.u32 %s339_s22, 4 }
  0x28   : > { %s730_s14 = sshll.u32 %s1170_s29, 2  ;;  %772 = vmatprep.subr.bf16.mxu0 %v948_v0  ;;  %766 = vmatprep.subr.bf16.mxu1 %v948_v0  ;;  %v840_v33 = vld [vmem:[#allocation2] sm:$0xff]   ;;  %s341_s29 = scalar_lea.vmem [#allocation5], %s728_s25 }
  0x29   : > { %s346_s21 = scalar_lea.vmem %s1151_s0, %s730_s14  ;;  %v734_v34 = vld [vmem:[%s1155_s4] ss:$0 sm:$0xff]  ;;  %s648_s14 = sshll.u32 %s341_s29, 4  ;;  %s1109_s14 = int_to_ptr.vmem [resolvable:$true] %s648_s14 }
  0x2a   : > { %v836_v3 = vld [vmem:[%s346_s21] sm:$0xff]   ;;  %s1107_s21 = scalar_lea.hbm %s1160_s9, %s749_s28  ;;  %s1111_s23 = scalar_lea.sflag [#allocation4], %s339_s22 }
  0x2b   : > { %761 = vmatmul.mubr.msk.bf16.vlgmr.msra.gmra.mxu0 %vm365_vm2, %v836_v3  ;;  %767 = vmatpush3.bf16.msra.mxu1 %v838_v5  ;;  %v738_v60 = vld [vmem:[%s1157_s6] ss:$0 sm:$0xff]  ;;  %v595_v3 = vlaneseq  ;;  %s879_s24 = scalar_lea.vmem %s1109_s14, 256  ;;  %s950_s13 = smov [#allocation5]  }
  0x2c   : > { %776 = vmatprep.mubr.msk.bf16.mxu0 %vm949_vm0, %v948_v0  ;;  %773 = vmatpush3.bf16.msra.mxu0 %v839_v32  ;;  %p880_p8 = scmp.ne.s32.totalorder %s1109_s14, %s879_s24  ;;  %s883_s25 = sshll.u32 %s950_s13, 4  ;;  %s884_s25 = int_to_ptr.vmem [resolvable:$false] %s883_s25 }
  0x2d   : > { %774 = vmatprep.subr.bf16.mxu0 %v948_v0  ;;  %v596_v4 = vand.u32 127, %v595_v3  ;;  %s885_s26 = scalar_lea.vmem %s884_s25, 512  ;;  %p886_p11 = scmp.lt.s32.totalorder %s1109_s14, %s884_s25 }
  0x2e   : > { %p881_p9 = pnand %p880_p8, %p1041_p5  ;;  %p887_p12 = scmp.lt.s32.totalorder %s885_s26, %s879_s24 }
  0x2f   : > { %vm597_vm4 = vcmp.lt.s32.totalorder %v596_v4, 32 }
  0x30   : > { %775 = vmatpush3.bf16.msra.mxu0 %v840_v33  ;;  %p882_p10 = pneg %p881_p9  ;;  %p888_p13 = por %p887_p12, %p886_p11 }
  0x32   : > { %p889_p0 = pnand %p888_p13, %p882_p10 }
  0xeb   : > { %v407_v7 = vpop.f32.mrf.mxu0 }
  0xec   : > { %v408_v8 = vadd.f32 %v731_v6, %v407_v7 }
  0xed   : > { %v762_v9 = vpop.f32.mrf.mxu0 }
  0xee   : > { %v418_v10 = vmul.f32 0.044715, %v408_v8  ;;  %v416_v15 = vmul.f32 0.7978846, %v408_v8  ;;  %v414_v26 = vmul.f32 0.5, %v408_v8 }
  0xef   : > { %v410_v11 = vpop.f32.mrf.mxu0 }
  0xf0   : > { %v420_v12 = vmul.f32 %v418_v10, %v408_v8  ;;  %v411_v13 = vadd.f32 %v731_v6, %v410_v11 }
  0xf1   : > { %v763_v14 = vpop.f32.mrf.mxu0 }
  0xf2   : > { %v422_v16 = vadd.f32 1.0, %v420_v12  ;;  %v419_v17 = vmul.f32 0.044715, %v411_v13  ;;  %v417_v20 = vmul.f32 0.7978846, %v411_v13  ;;  %v415_v27 = vmul.f32 0.5, %v411_v13 }
  0xf4   : > { %v424_v18 = vmul.f32 %v422_v16, %v416_v15  ;;  %v421_v19 = vmul.f32 %v419_v17, %v411_v13 }
  0xf6   : > { %841 = vtanh.f32 %v424_v18  ;;  %v423_v21 = vadd.f32 1.0, %v421_v19 }
  0xf8   : > { %v425_v22 = vmul.f32 %v423_v21, %v417_v20 }
  0xfa   : > { %843 = vtanh.f32 %v425_v22  ;;  %v742_v22 = vld [vmem:[%s1158_s7] ss:$0 sm:$0xff] }
 0x103   : > { %v842_v23 = vpop.eup %841 }
 0x104   : > { %v428_v24 = vadd.f32 1.0, %v842_v23 }
 0x106   : > { %v430_v29 = vmul.f32 %v428_v24, %v414_v26  ;;  %v743_v24 = vld [vmem:[%s1159_s8] ss:$0 sm:$0xff] }
 0x107   : > { %v844_v25 = vpop.eup %843 }
 0x108   : > { %v429_v28 = vadd.f32 1.0, %v844_v25 }
 0x10a   : > { %v431_v30 = vmul.f32 %v429_v28, %v415_v27 }
 0x10c   : > { %v432_v31 = vpack.c.bf16 %v431_v30, %v430_v29 }
 0x10e   : > { %769 = vmatmul.mubr.msk.bf16.vlgmr.msra.gmra.mxu1 %vm456_vm3, %v432_v31 }
 0x1ce   : > { %v494_v35 = vpop.f32.mrf.mxu1 }
 0x1cf   : > { %v495_v36 = vadd.f32 %v734_v34, %v494_v35 }
 0x1d0   : > { %v770_v37 = vpop.f32.mrf.mxu1 }
 0x1d1   : > { %v505_v38 = vmul.f32 0.044715, %v495_v36  ;;  %v503_v43 = vmul.f32 0.7978846, %v495_v36  ;;  %v501_v54 = vmul.f32 0.5, %v495_v36 }
 0x1d2   : > { %v497_v39 = vpop.f32.mrf.mxu1 }
 0x1d3   : > { %v507_v40 = vmul.f32 %v505_v38, %v495_v36  ;;  %v498_v41 = vadd.f32 %v734_v34, %v497_v39 }
 0x1d4   : > { %v771_v42 = vpop.f32.mrf.mxu1 }
 0x1d5   : > { %v509_v44 = vadd.f32 1.0, %v507_v40  ;;  %v506_v45 = vmul.f32 0.044715, %v498_v41  ;;  %v504_v48 = vmul.f32 0.7978846, %v498_v41  ;;  %v502_v55 = vmul.f32 0.5, %v498_v41 }
 0x1d7   : > { %v511_v46 = vmul.f32 %v509_v44, %v503_v43  ;;  %v508_v47 = vmul.f32 %v506_v45, %v498_v41 }
 0x1d9   : > { %845 = vtanh.f32 %v511_v46  ;;  %v510_v49 = vadd.f32 1.0, %v508_v47 }
 0x1db   : > { %v512_v50 = vmul.f32 %v510_v49, %v504_v48 }
 0x1dd   : > { %847 = vtanh.f32 %v512_v50 }
 0x1e6   : > { %v846_v51 = vpop.eup %845 }
 0x1e7   : > { %v515_v52 = vadd.f32 1.0, %v846_v51 }
 0x1e9   : > { %v517_v57 = vmul.f32 %v515_v52, %v501_v54 }
 0x1ea   : > { %v848_v53 = vpop.eup %847 }
 0x1eb   : > { %v516_v56 = vadd.f32 1.0, %v848_v53 }
 0x1ed   : > { %v518_v58 = vmul.f32 %v516_v56, %v502_v55 }
 0x1ef   : > { %v519_v59 = vpack.c.bf16 %v518_v58, %v517_v57 }
 0x1f1   : > { %777 = vmatmul.mubr.msk.bf16.vlgmr.msra.gmra.mxu0 %vm456_vm3, %v519_v59 }
 0x2b1   : > { %v580_v61 = vpop.f32.mrf.mxu0 }
 0x2b2   : > { %v581_v62 = vadd.f32 %v738_v60, %v580_v61 }
 0x2b3   : > { %v778_v63 = vpop.f32.mrf.mxu0 }
 0x2b4   : > { %587 = vadd.xlane.f32.xlu0 %v581_v62 }
 0x2b5   : > { %v583_v0 = vpop.f32.mrf.mxu0 }
 0x2b6   : > { %v584_v1 = vadd.f32 %v738_v60, %v583_v0 }
 0x2b7   : > { %v779_v2 = vpop.f32.mrf.mxu0 }
 0x2b8   : > { %589 = vadd.xlane.f32.xlu0 %v584_v1 }
 0x33d   : > { %v588_v5 = vpop.xlane.xlu0 %587 }
 0x33e   : > { %v591_v6 = vmul.f32 0.03125, %v588_v5 }
 0x340   : > { %v593_v7 = vsub.f32 %v581_v62, %v591_v6 }
 0x341   : > { %v590_v8 = vpop.xlane.xlu0 %589 }
 0x342   : > { %v592_v9 = vmul.f32 0.03125, %v590_v8  ;;  %v598_v10 = vsel %vm597_vm4, %v593_v7, 0.0 }
 0x343   : > { %v600_v11 = vmul.f32 %v598_v10, %v598_v10 }
 0x344   : > { %v594_v12 = vsub.f32 %v584_v1, %v592_v9 }
 0x345   : > { %602 = vadd.xlane.f32.xlu1 %v600_v11 }
 0x346   : > { %v599_v13 = vsel %vm597_vm4, %v594_v12, 0.0 }
 0x347   : > { %v601_v14 = vmul.f32 %v599_v13, %v599_v13 }
 0x349   : > { %604 = vadd.xlane.f32.xlu1 %v601_v14 }
 0x3ce   : > { %v603_v15 = vpop.xlane.xlu1 %602 }
 0x3cf   : > { %v606_v16 = vmul.f32 0.03125, %v603_v15 }
 0x3d1   : > { %v608_v17 = vadd.f32 1e-05, %v606_v16 }
 0x3d2   : > { %v605_v18 = vpop.xlane.xlu1 %604 }
 0x3d3   : > { %849 = vrsqrt.f32 %v608_v17  ;;  %v607_v19 = vmul.f32 0.03125, %v605_v18 }
 0x3d5   : > { %v609_v20 = vadd.f32 1e-05, %v607_v19 }
 0x3d7   : > { %851 = vrsqrt.f32 %v609_v20 }
 0x3e0   : > { %v850_v21 = vpop.eup %849 }
 0x3e1   : > { %v612_v23 = vmul.f32 %v850_v21, %v598_v10 }
 0x3e3   : > { %v621_v25 = vmul.f32 %v742_v22, %v612_v23 }
 0x3e4   : > { %v852_v26 = vpop.eup %851 }
 0x3e5   : > { %v630_v27 = vadd.f32 %v743_v24, %v621_v25  ;;  %v613_v28 = vmul.f32 %v852_v26, %v599_v13 }
 0x3e7   : > { %v622_v29 = vmul.f32 %v742_v22, %v613_v28  ;;  %632 = vst [vmem:[%s341_s29] sm:$0xff] %v630_v27 }
 0x3e9   : > { %v631_v30 = vadd.f32 %v743_v24, %v622_v29 }
 0x3eb   : > { %633 = vst [vmem:[%s341_s29 + $0x8] sm:$0xff] %v631_v30 }
 0x3ec   : > { %892 = shalt.err (!%p889_p0)
}
 0x3ed   : > { %s893_s22 = scalar_lea.hbm %s1107_s21, 256  ;;  %s897_s29 = scalar_lea.hbm %s1160_s9, 512 }
 0x3ee   : > { %p894_p1 = scmp.ne.s32.totalorder %s1107_s21, %s893_s22  ;;  %p898_p4 = scmp.lt.s32.totalorder %s1107_s21, %s1160_s9 }
 0x3ef   : > { %p899_p7 = scmp.lt.s32.totalorder %s897_s29, %s893_s22 }
 0x3f0   : > { %p895_p2 = pnand %p894_p1, %p1041_p5 }
 0x3f1   : > { %p900_p6 = por %p899_p7, %p898_p4 }
 0x3f2   : > { %p896_p3 = pneg %p895_p2 }
 0x3f4   : > { %p901_p8 = pnand %p900_p6, %p896_p3 }
 0x3f6   : > { %904 = shalt.err (!%p901_p8)
}
 0x3f7   : > { %s951_s24 = smov 128   ;;  %s952_s13 = smov 8  }
 0x3f8   : > { %784 = dma.vmem_to_hbm [thread:$0]  (%p1041_p5), %s1109_s14, 256, %s1107_s21, %s1111_s23, %s951_s24, %s951_s24, %s952_s13  }
 0x3f9 PF: > { %p796_p9 = scmp.ge.s32.totalorder %s943_s12, 2  ;;  %s663_s25 = sand.u32 1, %s931_s30  }
 0x3fa   : > { %p1164_p10 = scmp.ne.s32.totalorder %s1162_s20, 0  ;;  %s664_s26 = scalar_lea.sflag [#allocation4], %s663_s25 }
 0x3fc   : > { %p791_p11 = pnand %p796_p9, %p1164_p10 }
 0x3fe   : > { %p792_p12 = pneg %p791_p11 }
 0x400   : > { %926 = dma.done.wait (%p792_p12), %s664_s26, 256  }
 0x401   : > { %928 = vsyncadd (%p792_p12), %s664_s26, 4294967040  ;;  %p20_p13 = scmp.ge.s32.totalorder %s1028_s15, 4   ;;  %s1165_s30 = smov %s935_s10 }
 0x402   : > { %s1166_s10 = smov %s939_s11  ;;  %s1167_s11 = smov %s1039_s18 }
 0x403   : > { %s1168_s12 = smov %s1028_s15  ;;  %22 = sbr.rel (!%p20_p13) target bundleno = 4 (0x4), region = 96 }
 0x408   :  { %669 = vsyncpa [#allocation3], 1 }
 0x409   :  { %671 = vsyncpa [#allocation3 + $0x1], 1 }
 0x40a   :  { %672 = vsyncpa [#allocation4], 1 }
 0x40b   :  { %674 = vsyncpa [#allocation4 + $0x1], 1 }

// kernel: tpu_custom_call.1
= control target key start
LH: loop header
LB: loop body
LE: loop exit
PB: predicated region body
PF: predicated region fallthrough
CT: control target
= control target key end

     0   :  { %14 = vsyncpa [#allocation3], 0  ;;  %s1151_s0 = inlined_call_operand.vmem [shape: bf16[32,8], index: 0, kind: input, shape index: {}]   ;;  %s1152_s1 = inlined_call_operand.vmem [shape: bf16[8,32], index: 1, kind: input, shape index: {}]   ;;  %s1153_s2 = inlined_call_operand.vmem [shape: f32[1,32], index: 2, kind: input, shape index: {}]   ;;  %s1154_s3 = inlined_call_operand.vmem [shape: bf16[32,32], index: 3, kind: input, shape index: {}]   ;;  %s1155_s4 = inlined_call_operand.vmem [shape: f32[1,32], index: 4, kind: input, shape index: {}]   ;;  %s1156_s5 = inlined_call_operand.hbm [shape: bf16[32,128], index: 5, kind: input, shape index: {}]   ;;  %s1157_s6 = inlined_call_operand.vmem [shape: f32[1,128], index: 6, kind: input, shape index: {}]   ;;  %s1158_s7 = inlined_call_operand.vmem [shape: f32[1,128], index: 7, kind: input, shape index: {}]   ;;  %s1159_s8 = inlined_call_operand.vmem [shape: f32[1,128], index: 8, kind: input, shape index: {}]   ;;  %s1160_s9 = inlined_call_operand.hbm [shape: f32[32,128], index: 9, kind: output, shape index: {}]  }
   0x1   :  { %15 = vsyncpa [#allocation4], 0 }
   0x2   :  { %17 = vsyncpa [#allocation4 + $0x1], 0  ;;  %s1003_s30 = smov 0   ;;  %s1005_s10 = smov 0  }
   0x3   :  { %s1007_s11 = smov 0   ;;  %s1009_s12 = smov 0  }
   0x4 LB: > { %s1024_s13 = sadd.s32 4294967295, %s943_s12   ;;  %s722_s14 = sadd.s32 4294967294, %s943_s12   ;;  %s943_s12 = sphi %s1009_s12, %s1168_s12   ;;  %s939_s11 = sphi %s1007_s11, %s1167_s11   ;;  %s935_s10 = sphi %s1005_s10, %s1166_s10   ;;  %s931_s30 = sphi %s1003_s30, %s1165_s30  }
   0x5   : > { %s1028_s15 = sadd.s32 1, %s943_s12   ;;  %s224_s16 = sadd.s32 1, %s939_s11 }
   0x6   : > { %s221_s17 = ssub.s32 %s943_s12, %s1028_s15  ;;  %p234_p0 = scmp.ne.s32.totalorder %s939_s11, %s935_s10 }
   0x7   : > { %p222_p1 = scmp.eq.s32.totalorder %s221_s17, 0  ;;  %p235_p2 = scmp.eq.s32.totalorder %s1024_s13, 1 }
   0x8   : > { %p240_p3 = scmp.ne.s32.totalorder %s935_s10, %s931_s30  ;;  %p241_p4 = scmp.eq.s32.totalorder %s722_s14, 1 }
   0x9   : > { %s1039_s18 = scalar_select %p222_p1, %s939_s11, %s224_s16  }
   0xa   : > { %p1041_p5 = por %p235_p2, %p234_p0  ;;  %p1045_p6 = por %p241_p4, %p240_p3 }
   0xb   : > { %p723_p7 = scmp.ge.s32.totalorder %s943_s12, 1  ;;  %p248_p8 = scmp.lt.s32.totalorder %s943_s12, 3 }
   0xc   : > { %s1162_s20 = scalar_select %p1045_p6, 1, 0 }
   0xd   : > { %p794_p9 = scmp.eq.s32.totalorder %s1024_s13, 0  ;;  %p1052_p10 = pnand %p723_p7, %p248_p8 }
   0xe   : > { %s945_s22 = smov [#allocation2]  }
   0xf   : > { %s272_s23 = sshll.u32 %s945_s22, 4  ;;  %p786_p11 = pneg %p1052_p10  ;;  %s273_s23 = int_to_ptr.vmem [resolvable:$true] %s272_s23 }
  0x10   : > { %s864_s24 = scalar_lea.vmem %s273_s23, 256  ;;  %p872_p3 = scmp.lt.s32.totalorder %s273_s23, %s273_s23 }
  0x11   : > { %p787_p12 = pnand %p794_p9, %p786_p11  ;;  %p865_p0 = scmp.ne.s32.totalorder %s273_s23, %s864_s24 }
  0x12   : > { %p873_p4 = scmp.lt.s32.totalorder %s864_s24, %s864_s24 }
  0x13   : > { %p855_p13 = pneg %p787_p12 }
  0x14   : > { %p874_p6 = por %p873_p4, %p872_p3 }
  0x15   : > { %p867_p1 = pnand %p865_p0, %p855_p13 }
  0x17   : > { %p868_p2 = pneg %p867_p1 }
  0x19   : > { %p875_p7 = pnand %p874_p6, %p868_p2 }
  0x1b   : > { %878 = shalt.err (!%p875_p7)
}
  0x1c   : > { %s946_s25 = smov 64   ;;  %s947_s26 = smov 4  }
  0x1d   : > { %789 = dma.hbm_to_vmem [thread:$0]  (!%p787_p12), %s1156_s5, 256, %s273_s23, [#allocation3], %s946_s25, %s946_s25, %s947_s26  }
  0x1e   : > { %306 = sbr.rel (%p1052_p10) target bundleno = 1017 (0x3f9), region = 56 }
  0x23   : > { %922 = dma.done.wait (%p794_p9), [#allocation3], 256  }
  0x24   : > { %924 = vsyncadd (%p794_p9), [#allocation3], 4294967040  ;;  %s729_s29 = sshll.u32 %s1024_s13, 1  ;;  %v948_v0 = vmov 0.0   ;;  %vm949_vm0 = vmmov 0   ;;  %vm369_vm1 = vcmask 1043456  }
  0x25   : > { %758 = vmatprep.subr.bf16.mxu0 %v948_v0  ;;  %760 = vmatprep.mubr.msk.bf16.mxu0 %vm949_vm0, %v948_v0  ;;  %p343_p6 = scmp.lt.s32.totalorder %s729_s29, 3  ;;  %v352_v1 = vld [vmem:[%s1152_s1] sm:$0xf]  ;;  %vm365_vm2 = vcmask 64512   ;;  %v837_v4 = vld [vmem:[%s1154_s3 + $0x8] sm:$0xff]   ;;  %vm456_vm3 = vcmask 261120  }
  0x26   : > { %764 = vmatprep.subr.bf16.mxu1 %v948_v0  ;;  %768 = vmatprep.mubr.msk.bf16.mxu1 %vm949_vm0, %v948_v0  ;;  %v371_v2 = vsel %vm369_vm1, %v352_v1, 0  ;;  %v838_v5 = vld [vmem:[%s1154_s3] sm:$0xff]   ;;  %v839_v32 = vld [vmem:[#allocation2 + $0x8] sm:$0xff]   ;;  %s339_s22 = sand.u32 1, %s935_s10   ;;  %s749_s28 = sshll.u32 %s1024_s13, 8 }
  0x27   : > { %s1170_s29 = smov (!%p343_p6, %s729_s29), 3  ;;  %759 = vmatpush3.bf16.msra.mxu0 %v371_v2  ;;  %765 = vmatpush3.bf16.msra.mxu1 %v837_v4  ;;  %v731_v6 = vld [vmem:[%s1153_s2] ss:$0 sm:$0xff]  ;;  %s728_s25 = sshll.u32 %s339_s22, 4 }
  0x28   : > { %s730_s14 = sshll.u32 %s1170_s29, 2  ;;  %772 = vmatprep.subr.bf16.mxu0 %v948_v0  ;;  %766 = vmatprep.subr.bf16.mxu1 %v948_v0  ;;  %v840_v33 = vld [vmem:[#allocation2] sm:$0xff]   ;;  %s341_s29 = scalar_lea.vmem [#allocation5], %s728_s25 }
  0x29   : > { %s346_s21 = scalar_lea.vmem %s1151_s0, %s730_s14  ;;  %v734_v34 = vld [vmem:[%s1155_s4] ss:$0 sm:$0xff]  ;;  %s648_s14 = sshll.u32 %s341_s29, 4  ;;  %s1109_s14 = int_to_ptr.vmem [resolvable:$true] %s648_s14 }
  0x2a   : > { %v836_v3 = vld [vmem:[%s346_s21] sm:$0xff]   ;;  %s1107_s21 = scalar_lea.hbm %s1160_s9, %s749_s28  ;;  %s1111_s23 = scalar_lea.sflag [#allocation4], %s339_s22 }
  0x2b   : > { %761 = vmatmul.mubr.msk.bf16.vlgmr.msra.gmra.mxu0 %vm365_vm2, %v836_v3  ;;  %767 = vmatpush3.bf16.msra.mxu1 %v838_v5  ;;  %v738_v60 = vld [vmem:[%s1157_s6] ss:$0 sm:$0xff]  ;;  %v595_v3 = vlaneseq  ;;  %s879_s24 = scalar_lea.vmem %s1109_s14, 256  ;;  %s950_s13 = smov [#allocation5]  }
  0x2c   : > { %776 = vmatprep.mubr.msk.bf16.mxu0 %vm949_vm0, %v948_v0  ;;  %773 = vmatpush3.bf16.msra.mxu0 %v839_v32  ;;  %p880_p8 = scmp.ne.s32.totalorder %s1109_s14, %s879_s24  ;;  %s883_s25 = sshll.u32 %s950_s13, 4  ;;  %s884_s25 = int_to_ptr.vmem [resolvable:$false] %s883_s25 }
  0x2d   : > { %774 = vmatprep.subr.bf16.mxu0 %v948_v0  ;;  %v596_v4 = vand.u32 127, %v595_v3  ;;  %s885_s26 = scalar_lea.vmem %s884_s25, 512  ;;  %p886_p11 = scmp.lt.s32.totalorder %s1109_s14, %s884_s25 }
  0x2e   : > { %p881_p9 = pnand %p880_p8, %p1041_p5  ;;  %p887_p12 = scmp.lt.s32.totalorder %s885_s26, %s879_s24 }
  0x2f   : > { %vm597_vm4 = vcmp.lt.s32.totalorder %v596_v4, 32 }
  0x30   : > { %775 = vmatpush3.bf16.msra.mxu0 %v840_v33  ;;  %p882_p10 = pneg %p881_p9  ;;  %p888_p13 = por %p887_p12, %p886_p11 }
  0x32   : > { %p889_p0 = pnand %p888_p13, %p882_p10 }
  0xeb   : > { %v407_v7 = vpop.f32.mrf.mxu0 }
  0xec   : > { %v408_v8 = vadd.f32 %v731_v6, %v407_v7 }
  0xed   : > { %v762_v9 = vpop.f32.mrf.mxu0 }
  0xee   : > { %v418_v10 = vmul.f32 0.044715, %v408_v8  ;;  %v416_v15 = vmul.f32 0.7978846, %v408_v8  ;;  %v414_v26 = vmul.f32 0.5, %v408_v8 }
  0xef   : > { %v410_v11 = vpop.f32.mrf.mxu0 }
  0xf0   : > { %v420_v12 = vmul.f32 %v418_v10, %v408_v8  ;;  %v411_v13 = vadd.f32 %v731_v6, %v410_v11 }
  0xf1   : > { %v763_v14 = vpop.f32.mrf.mxu0 }
  0xf2   : > { %v422_v16 = vadd.f32 1.0, %v420_v12  ;;  %v419_v17 = vmul.f32 0.044715, %v411_v13  ;;  %v417_v20 = vmul.f32 0.7978846, %v411_v13  ;;  %v415_v27 = vmul.f32 0.5, %v411_v13 }
  0xf4   : > { %v424_v18 = vmul.f32 %v422_v16, %v416_v15  ;;  %v421_v19 = vmul.f32 %v419_v17, %v411_v13 }
  0xf6   : > { %841 = vtanh.f32 %v424_v18  ;;  %v423_v21 = vadd.f32 1.0, %v421_v19 }
  0xf8   : > { %v425_v22 = vmul.f32 %v423_v21, %v417_v20 }
  0xfa   : > { %843 = vtanh.f32 %v425_v22  ;;  %v742_v22 = vld [vmem:[%s1158_s7] ss:$0 sm:$0xff] }
 0x103   : > { %v842_v23 = vpop.eup %841 }
 0x104   : > { %v428_v24 = vadd.f32 1.0, %v842_v23 }
 0x106   : > { %v430_v29 = vmul.f32 %v428_v24, %v414_v26  ;;  %v743_v24 = vld [vmem:[%s1159_s8] ss:$0 sm:$0xff] }
 0x107   : > { %v844_v25 = vpop.eup %843 }
 0x108   : > { %v429_v28 = vadd.f32 1.0, %v844_v25 }
 0x10a   : > { %v431_v30 = vmul.f32 %v429_v28, %v415_v27 }
 0x10c   : > { %v432_v31 = vpack.c.bf16 %v431_v30, %v430_v29 }
 0x10e   : > { %769 = vmatmul.mubr.msk.bf16.vlgmr.msra.gmra.mxu1 %vm456_vm3, %v432_v31 }
 0x1ce   : > { %v494_v35 = vpop.f32.mrf.mxu1 }
 0x1cf   : > { %v495_v36 = vadd.f32 %v734_v34, %v494_v35 }
 0x1d0   : > { %v770_v37 = vpop.f32.mrf.mxu1 }
 0x1d1   : > { %v505_v38 = vmul.f32 0.044715, %v495_v36  ;;  %v503_v43 = vmul.f32 0.7978846, %v495_v36  ;;  %v501_v54 = vmul.f32 0.5, %v495_v36 }
 0x1d2   : > { %v497_v39 = vpop.f32.mrf.mxu1 }
 0x1d3   : > { %v507_v40 = vmul.f32 %v505_v38, %v495_v36  ;;  %v498_v41 = vadd.f32 %v734_v34, %v497_v39 }
 0x1d4   : > { %v771_v42 = vpop.f32.mrf.mxu1 }
 0x1d5   : > { %v509_v44 = vadd.f32 1.0, %v507_v40  ;;  %v506_v45 = vmul.f32 0.044715, %v498_v41  ;;  %v504_v48 = vmul.f32 0.7978846, %v498_v41  ;;  %v502_v55 = vmul.f32 0.5, %v498_v41 }
 0x1d7   : > { %v511_v46 = vmul.f32 %v509_v44, %v503_v43  ;;  %v508_v47 = vmul.f32 %v506_v45, %v498_v41 }
 0x1d9   : > { %845 = vtanh.f32 %v511_v46  ;;  %v510_v49 = vadd.f32 1.0, %v508_v47 }
 0x1db   : > { %v512_v50 = vmul.f32 %v510_v49, %v504_v48 }
 0x1dd   : > { %847 = vtanh.f32 %v512_v50 }
 0x1e6   : > { %v846_v51 = vpop.eup %845 }
 0x1e7   : > { %v515_v52 = vadd.f32 1.0, %v846_v51 }
 0x1e9   : > { %v517_v57 = vmul.f32 %v515_v52, %v501_v54 }
 0x1ea   : > { %v848_v53 = vpop.eup %847 }
 0x1eb   : > { %v516_v56 = vadd.f32 1.0, %v848_v53 }
 0x1ed   : > { %v518_v58 = vmul.f32 %v516_v56, %v502_v55 }
 0x1ef   : > { %v519_v59 = vpack.c.bf16 %v518_v58, %v517_v57 }
 0x1f1   : > { %777 = vmatmul.mubr.msk.bf16.vlgmr.msra.gmra.mxu0 %vm456_vm3, %v519_v59 }
 0x2b1   : > { %v580_v61 = vpop.f32.mrf.mxu0 }
 0x2b2   : > { %v581_v62 = vadd.f32 %v738_v60, %v580_v61 }
 0x2b3   : > { %v778_v63 = vpop.f32.mrf.mxu0 }
 0x2b4   : > { %587 = vadd.xlane.f32.xlu0 %v581_v62 }
 0x2b5   : > { %v583_v0 = vpop.f32.mrf.mxu0 }
 0x2b6   : > { %v584_v1 = vadd.f32 %v738_v60, %v583_v0 }
 0x2b7   : > { %v779_v2 = vpop.f32.mrf.mxu0 }
 0x2b8   : > { %589 = vadd.xlane.f32.xlu0 %v584_v1 }
 0x33d   : > { %v588_v5 = vpop.xlane.xlu0 %587 }
 0x33e   : > { %v591_v6 = vmul.f32 0.03125, %v588_v5 }
 0x340   : > { %v593_v7 = vsub.f32 %v581_v62, %v591_v6 }
 0x341   : > { %v590_v8 = vpop.xlane.xlu0 %589 }
 0x342   : > { %v592_v9 = vmul.f32 0.03125, %v590_v8  ;;  %v598_v10 = vsel %vm597_vm4, %v593_v7, 0.0 }
 0x343   : > { %v600_v11 = vmul.f32 %v598_v10, %v598_v10 }
 0x344   : > { %v594_v12 = vsub.f32 %v584_v1, %v592_v9 }
 0x345   : > { %602 = vadd.xlane.f32.xlu1 %v600_v11 }
 0x346   : > { %v599_v13 = vsel %vm597_vm4, %v594_v12, 0.0 }
 0x347   : > { %v601_v14 = vmul.f32 %v599_v13, %v599_v13 }
 0x349   : > { %604 = vadd.xlane.f32.xlu1 %v601_v14 }
 0x3ce   : > { %v603_v15 = vpop.xlane.xlu1 %602 }
 0x3cf   : > { %v606_v16 = vmul.f32 0.03125, %v603_v15 }
 0x3d1   : > { %v608_v17 = vadd.f32 1e-05, %v606_v16 }
 0x3d2   : > { %v605_v18 = vpop.xlane.xlu1 %604 }
 0x3d3   : > { %849 = vrsqrt.f32 %v608_v17  ;;  %v607_v19 = vmul.f32 0.03125, %v605_v18 }
 0x3d5   : > { %v609_v20 = vadd.f32 1e-05, %v607_v19 }
 0x3d7   : > { %851 = vrsqrt.f32 %v609_v20 }
 0x3e0   : > { %v850_v21 = vpop.eup %849 }
 0x3e1   : > { %v612_v23 = vmul.f32 %v850_v21, %v598_v10 }
 0x3e3   : > { %v621_v25 = vmul.f32 %v742_v22, %v612_v23 }
 0x3e4   : > { %v852_v26 = vpop.eup %851 }
 0x3e5   : > { %v630_v27 = vadd.f32 %v743_v24, %v621_v25  ;;  %v613_v28 = vmul.f32 %v852_v26, %v599_v13 }
 0x3e7   : > { %v622_v29 = vmul.f32 %v742_v22, %v613_v28  ;;  %632 = vst [vmem:[%s341_s29] sm:$0xff] %v630_v27 }
 0x3e9   : > { %v631_v30 = vadd.f32 %v743_v24, %v622_v29 }
 0x3eb   : > { %633 = vst [vmem:[%s341_s29 + $0x8] sm:$0xff] %v631_v30 }
 0x3ec   : > { %892 = shalt.err (!%p889_p0)
}
 0x3ed   : > { %s893_s22 = scalar_lea.hbm %s1107_s21, 256  ;;  %s897_s29 = scalar_lea.hbm %s1160_s9, 512 }
 0x3ee   : > { %p894_p1 = scmp.ne.s32.totalorder %s1107_s21, %s893_s22  ;;  %p898_p4 = scmp.lt.s32.totalorder %s1107_s21, %s1160_s9 }
 0x3ef   : > { %p899_p7 = scmp.lt.s32.totalorder %s897_s29, %s893_s22 }
 0x3f0   : > { %p895_p2 = pnand %p894_p1, %p1041_p5 }
 0x3f1   : > { %p900_p6 = por %p899_p7, %p898_p4 }
 0x3f2   : > { %p896_p3 = pneg %p895_p2 }
 0x3f4   : > { %p901_p8 = pnand %p900_p6, %p896_p3 }
 0x3f6   : > { %904 = shalt.err (!%p901_p8)
}
 0x3f7   : > { %s951_s24 = smov 128   ;;  %s952_s13 = smov 8  }
 0x3f8   : > { %784 = dma.vmem_to_hbm [thread:$0]  (%p1041_p5), %s1109_s14, 256, %s1107_s21, %s1111_s23, %s951_s24, %s951_s24, %s952_s13  }
 0x3f9 PF: > { %p796_p9 = scmp.ge.s32.totalorder %s943_s12, 2  ;;  %s663_s25 = sand.u32 1, %s931_s30  }
 0x3fa   : > { %p1164_p10 = scmp.ne.s32.totalorder %s1162_s20, 0  ;;  %s664_s26 = scalar_lea.sflag [#allocation4], %s663_s25 }
 0x3fc   : > { %p791_p11 = pnand %p796_p9, %p1164_p10 }
 0x3fe   : > { %p792_p12 = pneg %p791_p11 }
 0x400   : > { %926 = dma.done.wait (%p792_p12), %s664_s26, 256  }
 0x401   : > { %928 = vsyncadd (%p792_p12), %s664_s26, 4294967040  ;;  %p20_p13 = scmp.ge.s32.totalorder %s1028_s15, 4   ;;  %s1165_s30 = smov %s935_s10 }
 0x402   : > { %s1166_s10 = smov %s939_s11  ;;  %s1167_s11 = smov %s1039_s18 }
 0x403   : > { %s1168_s12 = smov %s1028_s15  ;;  %22 = sbr.rel (!%p20_p13) target bundleno = 4 (0x4), region = 96 }
 0x408   :  { %669 = vsyncpa [#allocation3], 1 }
 0x409   :  { %671 = vsyncpa [#allocation3 + $0x1], 1 }
 0x40a   :  { %672 = vsyncpa [#allocation4], 1 }
 0x40b   :  { %674 = vsyncpa [#allocation4 + $0x1], 1 }

</bundles_post_ra>
